<compile_context>
chip_gen: v7x
topology: tpu7x:2x2x1
jax: 0.10.0
libtpu: 0.0.40
codegen_flags: <defaults>
</compile_context>

<pallas_src>
import jax
import jax.numpy as jnp
from jax.experimental import pallas as pl
from jax.experimental.pallas import tpu as pltpu

_LANE = 128                               # TPU lane width (last vreg dim)
_TARGET_BLOCK_BYTES = 8 * 1024 * 1024     # ~8 MiB per block (sized for v7x)
_VMEM_LIMIT_BYTES = 48 * 1024 * 1024      # in+out, double-buffered = 32 MiB + headroom


def _copy_kernel(x_ref, o_ref):
    # Identity copy of the current (rows_tile, lanes) tile.
    o_ref[...] = x_ref[...]


def _resolve_shape(shape, total):
    """Resolve a single -1 (torch reshape style) against `total` elements."""
    shape = tuple(int(d) for d in shape)
    if -1 in shape:
        known = 1
        for d in shape:
            if d != -1:
                known *= d
        shape = tuple(total // known if d == -1 else d for d in shape)
    return shape


def reshape_layer(x, shape, *, use_pallas=True, donate=False):
    """Pallas implementation of ReshapeLayer(shape)(x): (B, ...) -> (B, *shape)."""
    B = x.shape[0]
    total = 1
    for d in x.shape[1:]:
        total *= d
    shape = _resolve_shape(shape, total)
    target_total = 1
    for d in shape:
        target_total *= d
    if total != target_total:
        raise ValueError(
            f"cannot reshape {x.shape} to ({B}, {tuple(shape)}): element count mismatch")

    if not use_pallas:
        # Metadata-only reshape: 0 HBM bytes moved.  The right choice in production.
        return x.reshape(B, *shape)

    total_all = B * total
    itemsize = jnp.dtype(x.dtype).itemsize

    # Widest lane-dense last dim (multiple of 128) that exactly divides the payload.
    lanes = 0
    for cand in (8 * _LANE, 4 * _LANE, 2 * _LANE, _LANE):
        if total_all % cand == 0:
            lanes = cand
            break
    if lanes == 0:
        # Padding would be required (pad + slice => ~3x HBM traffic outside the
        # kernel); the metadata-only reshape is strictly better and correct.
        return x.reshape(B, *shape)

    rows = total_all // lanes
    x2d = x.reshape(rows, lanes)          # metadata-only view of the row-major payload

    # Dtype-aware sublane alignment so blocks are native tiles (no packed raggedness).
    sub = max(8, 32 // itemsize)

    # Rows per block: largest sublane-aligned tile within the per-block byte budget.
    max_rows = max(sub, _TARGET_BLOCK_BYTES // (lanes * itemsize))
    max_rows = (max_rows // sub) * sub

    if rows > max_rows:
        rows_tile = max_rows
    elif rows >= 2 * sub:
        # Whole payload fits one block budget: still emit >=2 grid steps so the
        # "parallel" axis can shard across both v7x TensorCores.
        rows_tile = max(sub, (((rows + 1) // 2) // sub) * sub)
    else:
        rows_tile = rows                  # single full-extent block (always legal)

    grid = (pl.cdiv(rows, rows_tile),)    # ragged last block masked by Pallas

    # Only alias in-place when the caller actually donates x (otherwise XLA would
    # insert a defensive copy to honor the alias, doubling traffic).
    alias = {0: 0} if donate else {}

    out2d = pl.pallas_call(
        _copy_kernel,
        out_shape=jax.ShapeDtypeStruct((rows, lanes), x.dtype),
        grid_spec=pltpu.PrefetchScalarGridSpec(
            num_scalar_prefetch=0,
            grid=grid,
            in_specs=[pl.BlockSpec((rows_tile, lanes), lambda i: (i, 0))],
            out_specs=pl.BlockSpec((rows_tile, lanes), lambda i: (i, 0)),
        ),
        input_output_aliases=alias,
        compiler_params=pltpu.CompilerParams(
            dimension_semantics=("parallel",),
            vmem_limit_bytes=_VMEM_LIMIT_BYTES,
        ),
    )(x2d)

    # Final reshape is metadata-only (contiguous row-major payload).
    return out2d.reshape(B, *shape)


if __name__ == "__main__":
    key = jax.random.PRNGKey(0)

    # Primary case (matches the module spec): batch=2, channels=4, spatial=16x16.
    # ReshapeLayer(shape=(16, 64)) : (2, 4, 16, 16) -> (2, 16, 64)
    x = jax.random.normal(key, (2, 4, 16, 16), dtype=jnp.float32)
    target_shape = (16, 64)

    y = jax.block_until_ready(reshape_layer(x, target_shape, use_pallas=True))
    y_ref = x.reshape(x.shape[0], *target_shape)
    assert y.shape == (2, 16, 64), y.shape
    assert y.dtype == x.dtype
    assert jnp.array_equal(y, y_ref), "mismatch vs reference reshape"

    # Metadata-only fast path must also match.
    y_fast = jax.block_until_ready(reshape_layer(x, target_shape, use_pallas=False))
    assert jnp.array_equal(y_fast, y_ref), "mismatch on metadata-only path"

    # Secondary case exercising the multi-block (grid > 1) path: (4,8,32,32) -> (4,32,256).
    key2 = jax.random.PRNGKey(0)
    x2 = jax.random.normal(key2, (4, 8, 32, 32), dtype=jnp.float32)
    y2 = jax.block_until_ready(reshape_layer(x2, (32, 256), use_pallas=True))
    assert jnp.array_equal(y2, x2.reshape(4, 32, 256)), "mismatch on multi-block path"

    print("KERNEL_OK")
</pallas_src>

<mosaic_0001>
module attributes {stable_mosaic.version = 11 : i64} {
  func.func @_copy_kernel(%arg0: i32, %arg1: memref<2x1024xf32, #tpu.memory_space<vmem>>, %arg2: memref<2x1024xf32, #tpu.memory_space<vmem>>) attributes {dimension_semantics = [#tpu.dimension_semantics<parallel>], iteration_bounds = array<i64: 1>, scalar_prefetch = 0 : i64, scratch_operands = 0 : i64, tpu.core_type = #tpu.core_type<tc>, window_params = [{transform_indices = @transform_0, window_bounds = array<i64: 2, 1024>}, {transform_indices = @transform_1, window_bounds = array<i64: 2, 1024>}]} {
    %c0 = arith.constant 0 : index
    %c0_0 = arith.constant 0 : index
    %0 = vector.load %arg1[%c0, %c0_0] : memref<2x1024xf32, #tpu.memory_space<vmem>>, vector<2x1024xf32>
    %c0_1 = arith.constant 0 : index
    %c0_2 = arith.constant 0 : index
    %1 = vector.load %arg2[%c0_1, %c0_2] : memref<2x1024xf32, #tpu.memory_space<vmem>>, vector<2x1024xf32>
    tpu.vector_store %arg2[%c0_1, %c0_2], %0 {strides = array<i32>} : memref<2x1024xf32, #tpu.memory_space<vmem>>, vector<2x1024xf32>,
    return
  }
  func.func @transform_0(%arg0: i32) -> (i32, i32) {
    %c0_i32 = arith.constant 0 : i32
    %c0_i32_0 = arith.constant 0 : i32
    return %arg0, %c0_i32 : i32, i32
  }
  func.func @transform_1(%arg0: i32) -> (i32, i32) {
    %c0_i32 = arith.constant 0 : i32
    %c0_i32_0 = arith.constant 0 : i32
    return %arg0, %c0_i32 : i32, i32
  }
}

</mosaic_0001>

<bundles_post_ra>
// kernel: tpu_custom_call.1
= control target key start
LH: loop header
LB: loop body
LE: loop exit
PB: predicated region body
PF: predicated region fallthrough
CT: control target
= control target key end

     0   :  { %6 = vsyncpa [#allocation3], 0  ;;  %s126_s0 = inlined_call_operand.hbm [shape: f32[2,1024], index: 0, kind: input, shape index: {}]   ;;  %s127_s1 = inlined_call_operand.hbm [shape: f32[2,1024], index: 1, kind: output, shape index: {}]  }
   0x1   :  { %7 = vsyncpa [#allocation4], 0  ;;  %s90_s6 = smov [#allocation2]   ;;  %s42_s10 = scalar_lea.hbm %s126_s0, 256 }
   0x2   :  { %s14_s7 = sshll.u32 %s90_s6, 4  ;;  %p43_p0 = scmp.ne.s32.totalorder %s126_s0, %s42_s10  ;;  %s15_s7 = int_to_ptr.vmem [resolvable:$true] %s14_s7 }
   0x3   :  { %p46_p1 = scmp.lt.u32.totalorder %s42_s10, %s126_s0 }
   0x5   :  { %p48_p2 = pnand %p46_p1, %p43_p0 }
   0x7   :  { %51 = shalt.err (!%p48_p2)
}
   0x8   :  { %s52_s15 = scalar_lea.vmem %s15_s7, 256  ;;  %p57_p4 = scmp.lt.s32.totalorder %s15_s7, %s15_s7 }
   0x9   :  { %p53_p3 = scmp.ne.s32.totalorder %s15_s7, %s52_s15  ;;  %p58_p5 = scmp.lt.s32.totalorder %s52_s15, %s52_s15 }
   0xb   :  { %p59_p6 = por %p58_p5, %p57_p4 }
   0xd   :  { %p60_p7 = pnand %p59_p6, %p53_p3 }
   0xf   :  { %63 = shalt.err (!%p60_p7)
}
  0x10   :  { %17 = dma.hbm_to_vmem [thread:$0]  %s126_s0, 256, %s15_s7, [#allocation3]  }
  0x11   :  { %86 = dma.done.wait [#allocation3], 256  }
  0x12   :  { %87 = vsyncadd [#allocation3], 4294967040  ;;  %s91_s18 = smov [#allocation5]   ;;  %v21_v0 = vld [vmem:[#allocation2] sm:$0xff]  ;;  %v22_v1 = vld [vmem:[#allocation2 + $0x8] sm:$0xff] }
  0x13   :  { %s31_s19 = sshll.u32 %s91_s18, 4  ;;  %23 = vst [vmem:[#allocation5] sm:$0xff] %v21_v0  ;;  %24 = vst [vmem:[#allocation5 + $0x8] sm:$0xff] %v22_v1  ;;  %s32_s19 = int_to_ptr.vmem [resolvable:$true] %s31_s19 }
  0x14   :  { %s64_s20 = scalar_lea.vmem %s32_s19, 256  ;;  %p69_p9 = scmp.lt.s32.totalorder %s32_s19, %s32_s19 }
  0x15   :  { %p65_p8 = scmp.ne.s32.totalorder %s32_s19, %s64_s20  ;;  %p70_p10 = scmp.lt.s32.totalorder %s64_s20, %s64_s20 }
  0x17   :  { %p71_p11 = por %p70_p10, %p69_p9 }
  0x19   :  { %p72_p12 = pnand %p71_p11, %p65_p8 }
  0x1b   :  { %75 = shalt.err (!%p72_p12)
}
  0x1c   :  { %s76_s0 = scalar_lea.hbm %s127_s1, 256 }
  0x1d   :  { %p77_p13 = scmp.ne.s32.totalorder %s127_s1, %s76_s0  ;;  %p80_p0 = scmp.lt.u32.totalorder %s76_s0, %s127_s1 }
  0x1f   :  { %p82_p1 = pnand %p80_p0, %p77_p13 }
  0x21   :  { %85 = shalt.err (!%p82_p1)
}
  0x22   :  { %34 = dma.vmem_to_hbm [thread:$0]  %s32_s19, 256, %s127_s1, [#allocation4]  }
  0x23   :  { %88 = dma.done.wait [#allocation4], 256  }
  0x24   :  { %89 = vsyncadd [#allocation4], 4294967040 }
  0x25   :  { %38 = vsyncpa [#allocation3], 1 }
  0x26   :  { %39 = vsyncpa [#allocation4], 1 }

</bundles_post_ra>
